<compile_context>
chip_gen: v6e
topology: v6e:2x2x1
jax: 0.10.0
libtpu: 0.0.40
codegen_flags: <defaults>
</compile_context>

<pallas_src>
import jax
import jax.numpy as jnp
from jax import lax
from jax.experimental import pallas as pl
from jax.experimental.pallas import tpu as pltpu
from math import log, ceil

INPUT_SIZE = 11
HIDDEN1 = pow(2, ceil(log(INPUT_SIZE * 2) / log(2)))   # 32
HIDDEN2 = pow(2, ceil(log(INPUT_SIZE) / log(2)))       # 16
OUT_SIZE = 2

# Contract axis 1 of both operands:  W (out,in) x X (TB,in) -> (out, TB).
_NT_DIMS = (((1,), (1,)), ((), ()))


def mlp_kernel(x_ref, w1_ref, b1_ref, w2_ref, b2_ref, w3_ref, b3_ref, out_ref):
    """Fused 3-layer MLP on one (TB, 11) batch-major tile.

    The batch->feature transpose is folded into the first dot_general (Mosaic
    lowers it in-kernel); all intermediates are feature-major (lane = batch),
    so element-wise work and the output store are fully lane-dense.
    """
    x = x_ref[...]                                      # (TB, 11)

    # fc1 + ReLU: (32, 11) . (TB, 11)^T -> (32, TB), f32 accumulate
    h1 = lax.dot_general(w1_ref[...], x, _NT_DIMS,
                         preferred_element_type=jnp.float32)
    h1 = jnp.maximum(h1 + b1_ref[...], 0.0)             # f32 element-wise

    # fc2 + ReLU: (16, 32) @ (32, TB) -> (16, TB)   (h1 kept f32, no downcast)
    h2 = jnp.dot(w2_ref[...].astype(jnp.float32), h1,
                 preferred_element_type=jnp.float32)
    h2 = jnp.maximum(h2 + b2_ref[...], 0.0)

    # fc3 (logits): (2, 16) @ (16, TB) -> (2, TB)
    logits = jnp.dot(w3_ref[...].astype(jnp.float32), h2,
                     preferred_element_type=jnp.float32)
    out_ref[...] = (logits + b3_ref[...]).astype(out_ref.dtype)


def _pick_batch_tile(B, tb_max):
    """Batch tile (lane dim of intermediates/output): big to amortize per-step
    overhead, multiple of 128 when tiling, split so the grid keeps >=2 steps
    (v7x megacore) whenever the batch allows."""
    b_ceil = pl.cdiv(B, 128) * 128
    tb = min(tb_max, b_ceil)
    if tb >= b_ceil:
        if b_ceil >= 256:
            tb = max(128, (b_ceil // 2) // 128 * 128)   # >=2 grid steps
        else:
            tb = min(tb, B)                             # single full-extent block
    return tb


def classifier_forward(x, params, *, tb_max=16384, feature_major_output=False):
    """x: (B, INPUT_SIZE).  params: PyTorch-style {w: (out, in), b: (out,)}.

    Returns (B, OUT_SIZE) float32 logits (or the lane-dense (OUT_SIZE, B) slab
    if feature_major_output=True, saving the tiny post-kernel transpose).
    """
    B = x.shape[0]
    cdt = x.dtype

    TB = _pick_batch_tile(B, tb_max)
    grid = (pl.cdiv(B, TB),)

    # Weights in PyTorch-native (out, in) storage; biases as (out, 1) columns
    # so they broadcast across the lane (batch) dim.  All tiny.
    w1 = params["w1"].astype(cdt)                       # (32, 11)
    w2 = params["w2"].astype(cdt)                       # (16, 32)
    w3 = params["w3"].astype(cdt)                       # (2, 16)
    b1 = params["b1"].reshape(HIDDEN1, 1).astype(jnp.float32)
    b2 = params["b2"].reshape(HIDDEN2, 1).astype(jnp.float32)
    b3 = params["b3"].reshape(OUT_SIZE, 1).astype(jnp.float32)

    const = lambda shape: pl.BlockSpec(shape, lambda i: (0, 0))  # VMEM-resident

    bytes_per_sample = INPUT_SIZE * x.dtype.itemsize + OUT_SIZE * 4
    flops_per_sample = 2 * (INPUT_SIZE * HIDDEN1 + HIDDEN1 * HIDDEN2
                            + HIDDEN2 * OUT_SIZE)

    outT = pl.pallas_call(
        mlp_kernel,
        out_shape=jax.ShapeDtypeStruct((OUT_SIZE, B), jnp.float32),
        grid=grid,
        in_specs=[
            # Batch-major x blocks straight from HBM (no wrapper transpose/pad).
            pl.BlockSpec((TB, INPUT_SIZE), lambda i: (i, 0)),
            const((HIDDEN1, INPUT_SIZE)),                       # w1
            const((HIDDEN1, 1)),                                # b1
            const((HIDDEN2, HIDDEN1)),                          # w2
            const((HIDDEN2, 1)),                                # b2
            const((OUT_SIZE, HIDDEN2)),                         # w3
            const((OUT_SIZE, 1)),                               # b3
        ],
        # Lane-dense feature-major output slab.
        out_specs=pl.BlockSpec((OUT_SIZE, TB), lambda i: (0, i)),
        compiler_params=pltpu.CompilerParams(
            dimension_semantics=("parallel",),                  # megacore on v7x
            # (TB, 11) blocks lane-pad 11->128 in VMEM (VMEM cost only, not HBM
            # traffic); raise the scoped limit so big tiles fit on v5e/v7x while
            # staying under v7x's 64 MiB physical VMEM.
            vmem_limit_bytes=40 * 1024 * 1024,
        ),
        cost_estimate=pl.CostEstimate(
            flops=flops_per_sample * B,
            transcendentals=0,
            bytes_accessed=bytes_per_sample * B,
        ),
    )(x, w1, b1, w2, b2, w3, b3)

    if feature_major_output:
        return outT                                      # (2, B), lane-dense
    # Tiny layout pass back to PyTorch's (B, 2); skip via feature_major_output.
    return jnp.transpose(outT)


def init_params(key):
    """PyTorch-native shapes: w (out_features, in_features), b (out_features,)."""
    k1, k2, k3, k4, k5, k6 = jax.random.split(key, 6)

    def linear_init(kw, kb, fan_in, fan_out):
        bound = 1.0 / jnp.sqrt(jnp.float32(fan_in))
        w = jax.random.uniform(kw, (fan_out, fan_in), jnp.float32, -bound, bound)
        b = jax.random.uniform(kb, (fan_out,), jnp.float32, -bound, bound)
        return w, b

    w1, b1 = linear_init(k1, k2, INPUT_SIZE, HIDDEN1)
    w2, b2 = linear_init(k3, k4, HIDDEN1, HIDDEN2)
    w3, b3 = linear_init(k5, k6, HIDDEN2, OUT_SIZE)
    return {"w1": w1, "b1": b1, "w2": w2, "b2": b2, "w3": w3, "b3": b3}


def reference_forward(x, params):
    hp = jax.lax.Precision.HIGHEST
    h1 = jnp.maximum(jnp.dot(x, params["w1"].T, precision=hp) + params["b1"], 0.0)
    h2 = jnp.maximum(jnp.dot(h1, params["w2"].T, precision=hp) + params["b2"], 0.0)
    return jnp.dot(h2, params["w3"].T, precision=hp) + params["b3"]


if __name__ == "__main__":
    key = jax.random.PRNGKey(0)
    kx, kp = jax.random.split(key)
    params = init_params(kp)

    # Small batch: single full-extent block.
    B = 8
    x = jax.random.normal(kx, (B, INPUT_SIZE), dtype=jnp.float32)
    out = jax.block_until_ready(classifier_forward(x, params))
    ref = reference_forward(x, params)
    assert out.shape == (B, OUT_SIZE), out.shape
    assert jnp.allclose(out, ref, atol=1e-3, rtol=1e-3), "small-batch mismatch"

    # Multi-step grid with a ragged final tile (exercises edge-block masking
    # and the megacore >=2-step split).
    B2 = 300
    x2 = jax.random.normal(jax.random.PRNGKey(1), (B2, INPUT_SIZE), dtype=jnp.float32)
    out2 = jax.block_until_ready(classifier_forward(x2, params))
    ref2 = reference_forward(x2, params)
    assert out2.shape == (B2, OUT_SIZE), out2.shape
    assert jnp.allclose(out2, ref2, atol=1e-3, rtol=1e-3), "tiled-batch mismatch"

    # Lane-dense output fast path (no post-kernel transpose).
    outT = jax.block_until_ready(
        classifier_forward(x2, params, feature_major_output=True))
    assert outT.shape == (OUT_SIZE, B2), outT.shape
    assert jnp.allclose(outT.T, ref2, atol=1e-3, rtol=1e-3), "slab mismatch"

    print("KERNEL_OK")
</pallas_src>

<mosaic_0001>
module attributes {stable_mosaic.version = 11 : i64} {
  func.func @mlp_kernel(%arg0: i32, %arg1: memref<8x11xf32, #tpu.memory_space<vmem>>, %arg2: memref<32x11xf32, #tpu.memory_space<vmem>>, %arg3: memref<32x1xf32, #tpu.memory_space<vmem>>, %arg4: memref<16x32xf32, #tpu.memory_space<vmem>>, %arg5: memref<16x1xf32, #tpu.memory_space<vmem>>, %arg6: memref<2x16xf32, #tpu.memory_space<vmem>>, %arg7: memref<2x1xf32, #tpu.memory_space<vmem>>, %arg8: memref<2x8xf32, #tpu.memory_space<vmem>>) attributes {dimension_semantics = [#tpu.dimension_semantics<parallel>], iteration_bounds = array<i64: 1>, scalar_prefetch = 0 : i64, scratch_operands = 0 : i64, tpu.core_type = #tpu.core_type<tc>, window_params = [{transform_indices = @transform_0, window_bounds = array<i64: 8, 11>}, {pipeline_mode = #tpu.pipeline_mode<synchronous>, transform_indices = @transform_1, window_bounds = array<i64: 32, 11>}, {pipeline_mode = #tpu.pipeline_mode<synchronous>, transform_indices = @transform_2, window_bounds = array<i64: 32, 1>}, {pipeline_mode = #tpu.pipeline_mode<synchronous>, transform_indices = @transform_3, window_bounds = array<i64: 16, 32>}, {pipeline_mode = #tpu.pipeline_mode<synchronous>, transform_indices = @transform_4, window_bounds = array<i64: 16, 1>}, {pipeline_mode = #tpu.pipeline_mode<synchronous>, transform_indices = @transform_5, window_bounds = array<i64: 2, 16>}, {pipeline_mode = #tpu.pipeline_mode<synchronous>, transform_indices = @transform_6, window_bounds = array<i64: 2, 1>}, {transform_indices = @transform_7, window_bounds = array<i64: 2, 8>}]} {
    %c0 = arith.constant 0 : index
    %c0_0 = arith.constant 0 : index
    %0 = vector.load %arg1[%c0, %c0_0] : memref<8x11xf32, #tpu.memory_space<vmem>>, vector<8x11xf32>
    %c0_1 = arith.constant 0 : index
    %c0_2 = arith.constant 0 : index
    %1 = vector.load %arg2[%c0_1, %c0_2] : memref<32x11xf32, #tpu.memory_space<vmem>>, vector<32x11xf32>
    %cst = arith.constant dense<0.000000e+00> : vector<32x8xf32>
    %2 = tpu.matmul %1, %0, %cst {dimension_numbers = #tpu.dot_dimension_numbers<[1], [1], [0], [0], [0, 0, 1, 0], [], []>} : vector<32x11xf32>, vector<8x11xf32>, vector<32x8xf32> -> vector<32x8xf32>
    %c0_3 = arith.constant 0 : index
    %c0_4 = arith.constant 0 : index
    %3 = vector.load %arg3[%c0_3, %c0_4] : memref<32x1xf32, #tpu.memory_space<vmem>>, vector<32x1xf32>
    %4 = vector.broadcast %3 : vector<32x1xf32> to vector<32x8xf32>
    %5 = arith.addf %2, %4 : vector<32x8xf32>
    %cst_5 = arith.constant 0.000000e+00 : f32
    %6 = vector.broadcast %cst_5 : f32 to vector<32x8xf32>
    %7 = arith.maximumf %5, %6 : vector<32x8xf32>
    %c0_6 = arith.constant 0 : index
    %c0_7 = arith.constant 0 : index
    %8 = vector.load %arg4[%c0_6, %c0_7] : memref<16x32xf32, #tpu.memory_space<vmem>>, vector<16x32xf32>
    %cst_8 = arith.constant dense<0.000000e+00> : vector<16x8xf32>
    %9 = tpu.matmul %8, %7, %cst_8 {dimension_numbers = #tpu.dot_dimension_numbers<[1], [0], [0], [1], [0, 0, 1, 1], [], []>} : vector<16x32xf32>, vector<32x8xf32>, vector<16x8xf32> -> vector<16x8xf32>
    %c0_9 = arith.constant 0 : index
    %c0_10 = arith.constant 0 : index
    %10 = vector.load %arg5[%c0_9, %c0_10] : memref<16x1xf32, #tpu.memory_space<vmem>>, vector<16x1xf32>
    %11 = vector.broadcast %10 : vector<16x1xf32> to vector<16x8xf32>
    %12 = arith.addf %9, %11 : vector<16x8xf32>
    %cst_11 = arith.constant 0.000000e+00 : f32
    %13 = vector.broadcast %cst_11 : f32 to vector<16x8xf32>
    %14 = arith.maximumf %12, %13 : vector<16x8xf32>
    %c0_12 = arith.constant 0 : index
    %c0_13 = arith.constant 0 : index
    %15 = vector.load %arg6[%c0_12, %c0_13] : memref<2x16xf32, #tpu.memory_space<vmem>>, vector<2x16xf32>
    %cst_14 = arith.constant dense<0.000000e+00> : vector<2x8xf32>
    %16 = tpu.matmul %15, %14, %cst_14 {dimension_numbers = #tpu.dot_dimension_numbers<[1], [0], [0], [1], [0, 0, 1, 1], [], []>} : vector<2x16xf32>, vector<16x8xf32>, vector<2x8xf32> -> vector<2x8xf32>
    %c0_15 = arith.constant 0 : index
    %c0_16 = arith.constant 0 : index
    %17 = vector.load %arg7[%c0_15, %c0_16] : memref<2x1xf32, #tpu.memory_space<vmem>>, vector<2x1xf32>
    %18 = vector.broadcast %17 : vector<2x1xf32> to vector<2x8xf32>
    %19 = arith.addf %16, %18 : vector<2x8xf32>
    %c0_17 = arith.constant 0 : index
    %c0_18 = arith.constant 0 : index
    %20 = vector.load %arg8[%c0_17, %c0_18] : memref<2x8xf32, #tpu.memory_space<vmem>>, vector<2x8xf32>
    tpu.vector_store %arg8[%c0_17, %c0_18], %19 {strides = array<i32>} : memref<2x8xf32, #tpu.memory_space<vmem>>, vector<2x8xf32>,
    return
  }
  func.func @transform_0(%arg0: i32) -> (i32, i32) {
    %c0_i32 = arith.constant 0 : i32
    %c0_i32_0 = arith.constant 0 : i32
    return %arg0, %c0_i32 : i32, i32
  }
  func.func @transform_1(%arg0: i32) -> (i32, i32) {
    %c0_i32 = arith.constant 0 : i32
    %c0_i32_0 = arith.constant 0 : i32
    %c0_i32_1 = arith.constant 0 : i32
    return %c0_i32, %c0_i32_0 : i32, i32
  }
  func.func @transform_2(%arg0: i32) -> (i32, i32) {
    %c0_i32 = arith.constant 0 : i32
    %c0_i32_0 = arith.constant 0 : i32
    %c0_i32_1 = arith.constant 0 : i32
    return %c0_i32, %c0_i32_0 : i32, i32
  }
  func.func @transform_3(%arg0: i32) -> (i32, i32) {
    %c0_i32 = arith.constant 0 : i32
    %c0_i32_0 = arith.constant 0 : i32
    %c0_i32_1 = arith.constant 0 : i32
    return %c0_i32, %c0_i32_0 : i32, i32
  }
  func.func @transform_4(%arg0: i32) -> (i32, i32) {
    %c0_i32 = arith.constant 0 : i32
    %c0_i32_0 = arith.constant 0 : i32
    %c0_i32_1 = arith.constant 0 : i32
    return %c0_i32, %c0_i32_0 : i32, i32
  }
  func.func @transform_5(%arg0: i32) -> (i32, i32) {
    %c0_i32 = arith.constant 0 : i32
    %c0_i32_0 = arith.constant 0 : i32
    %c0_i32_1 = arith.constant 0 : i32
    return %c0_i32, %c0_i32_0 : i32, i32
  }
  func.func @transform_6(%arg0: i32) -> (i32, i32) {
    %c0_i32 = arith.constant 0 : i32
    %c0_i32_0 = arith.constant 0 : i32
    %c0_i32_1 = arith.constant 0 : i32
    return %c0_i32, %c0_i32_0 : i32, i32
  }
  func.func @transform_7(%arg0: i32) -> (i32, i32) {
    %c0_i32 = arith.constant 0 : i32
    %c0_i32_0 = arith.constant 0 : i32
    return %c0_i32, %arg0 : i32, i32
  }
}

</mosaic_0001>

<bundles_post_ra>
// kernel: tpu_custom_call.1
= control target key start
LH: loop header
LB: loop body
LE: loop exit
PB: predicated region body
PF: predicated region fallthrough
CT: control target
= control target key end

     0   :  { %vm56_vm0 = vcmask 89088   ;;  %v432_v4 = vmov 0   ;;  %s532_s0 = inlined_call_operand.vmem [shape: f32[8,11], index: 0, kind: input, shape index: {}]   ;;  %s533_s1 = inlined_call_operand.vmem [shape: f32[32,11], index: 1, kind: input, shape index: {}]   ;;  %s534_s2 = inlined_call_operand.vmem [shape: f32[32,1], index: 2, kind: input, shape index: {}]   ;;  %s535_s3 = inlined_call_operand.vmem [shape: f32[16,32], index: 3, kind: input, shape index: {}]   ;;  %s536_s4 = inlined_call_operand.vmem [shape: f32[16,1], index: 4, kind: input, shape index: {}]   ;;  %s537_s5 = inlined_call_operand.vmem [shape: f32[2,16], index: 5, kind: input, shape index: {}]   ;;  %s538_s6 = inlined_call_operand.vmem [shape: f32[2,1], index: 6, kind: input, shape index: {}]   ;;  %s539_s7 = inlined_call_operand.hbm [shape: f32[2,8], index: 7, kind: output, shape index: {}]  }
   0x1   :  { %v27_v0 = vld [vmem:[%s532_s0] sm:$0xff]  ;;  %v35_v2 = vld [vmem:[%s534_s2 + $0x18] sm:$0xff]  ;;  %v29_v3 = vld [vmem:[%s533_s1 + $0x8] sm:$0xff]  ;;  %408 = vset.pattern.permute.xlu0 %v432_v4  ;;  %409 = vset.pattern.permute.xlu1 %v432_v4 }
   0x2   :  { %v28_v1 = vld [vmem:[%s533_s1] sm:$0xff]  ;;  %378 = vmatprep.subr.msk.mxu0 %vm56_vm0, %v27_v0  ;;  %v33_v5 = vld [vmem:[%s534_s2 + $0x8] sm:$0xff]  ;;  %v30_v6 = vld [vmem:[%s533_s1 + $0x10] sm:$0xff]  ;;  %53 = vperm.xlu0 %408, %v35_v2  }
   0x3   :  { %380 = vmatprep.mubr.msk.f32.mxu0 %vm56_vm0, %v28_v1  ;;  %379 = vmatpush3.xpose.msk.msra.mxu0 %vm56_vm0, %v27_v0  ;;  %v34_v7 = vld [vmem:[%s534_s2 + $0x10] sm:$0xff] }
   0x4   :  { %43 = vperm.xlu1 %409, %v33_v5  }
   0x5   :  { %12 = vsyncpa [#allocation3], 0  ;;  %v32_v8 = vld [vmem:[%s534_s2] sm:$0xff]  ;;  %v31_v9 = vld [vmem:[%s533_s1 + $0x18] sm:$0xff]  ;;  %vm175_vm1 = vcmask 261120   ;;  %v433_v31 = vmov 0.0  }
   0x6   :  { %381 = vmatmul.mubr.msk.f32.vlgmr.msra.gmra.mxu0 %vm56_vm0, %v29_v3  ;;  %48 = vperm.xlu0 %408, %v34_v7   ;;  %v164_v10 = vld [vmem:[%s536_s4 + $0x8] sm:$0xff]  ;;  %v163_v11 = vld [vmem:[%s536_s4] sm:$0xff]  ;;  %vm434_vm2 = vmmov 0   ;;  %vm266_vm3 = vcmask 130048   ;;  %vm340_vm4 = vcmask 58368  }
   0x7   :  { %383 = vmatprep.mubr.msk.f32.mxu0 %vm56_vm0, %v30_v6  ;;  %v260_v12 = vld [vmem:[%s538_s6] sm:$0x3]  ;;  %v162_v30 = vld [vmem:[%s535_s3 + $0x8] sm:$0xff]  ;;  %397 = vmatprep.subr.mxu0 %v433_v31 }
   0x8   :  { %38 = vperm.xlu1 %409, %v32_v8   ;;  %v161_v13 = vld [vmem:[%s535_s3] sm:$0xff]  ;;  %s435_s3 = smov [#allocation2]  }
   0x9   :  { %394 = vmatprep.mubr.msk.f32.mxu1 %vm175_vm1, %v161_v13  ;;  %v259_v40 = vld [vmem:[%s537_s5] sm:$0x3]  ;;  %s348_s26 = sshll.u32 %s435_s3, 4  ;;  %s349_s26 = int_to_ptr.vmem [resolvable:$true] %s348_s26 }
   0xa   :  { %384 = vmatmul.mubr.msk.f32.gmra.mxu0 %vm56_vm0, %v31_v9  ;;  %172 = vperm.xlu0 %408, %v164_v10   ;;  %s410_s27 = scalar_lea.vmem %s349_s26, 32  ;;  %p415_p1 = scmp.lt.s32.totalorder %s349_s26, %s349_s26 }
   0xb   :  { %401 = vmatprep.mubr.msk.f32.mxu0 %vm434_vm2, %v433_v31  ;;  %p411_p0 = scmp.ne.s32.totalorder %s349_s26, %s410_s27  ;;  %p416_p2 = scmp.lt.s32.totalorder %s410_s27, %s410_s27 }
   0xc   :  { %167 = vperm.xlu1 %409, %v163_v11  }
   0xd   :  { %p417_p3 = por %p416_p2, %p415_p1 }
   0xe   :  { %263 = vperm.xlu0 %408, %v260_v12  }
   0xf   :  { %p418_p4 = pnand %p417_p3, %p411_p0 }
  0x7d   :  { %v54_v14 = vpop.permute.xlu0 %53 }
  0x7f   :  { %v44_v15 = vpop.permute.xlu1 %43 }
  0x81   :  { %v49_v19 = vpop.permute.xlu0 %48 }
  0x83   :  { %v39_v21 = vpop.permute.xlu1 %38 }
  0x85   :  { %v173_v32 = vpop.permute.xlu0 %172 }
  0x87   :  { %v168_v35 = vpop.permute.xlu1 %167 }
  0x89   :  { %v264_v41 = vpop.permute.xlu0 %263 }
  0xc6   :  { %v382_v16 = vpop.f32.mrf.mxu0 }
  0xc7   :  { %v144_v23 = vadd.f32 %v382_v16, %v44_v15 }
  0xc8   :  { %v138_v17 = vpop.f32.mrf.mxu0 }
  0xc9   :  { %v139_v26 = vadd.f32 %v138_v17, %v39_v21  ;;  %v158_v28 = vmax.f32 %v144_v23, 0.0 }
  0xca   :  { %v385_v18 = vpop.f32.mrf.mxu0 }
  0xcb   :  { %v154_v20 = vadd.f32 %v385_v18, %v54_v14  ;;  %v157_v29 = vmax.f32 %v139_v26, 0.0 }
  0xcc   :  { %v148_v22 = vpop.f32.mrf.mxu0 }
  0xcd   :  { %v160_v24 = vmax.f32 %v154_v20, 0.0  ;;  %v149_v25 = vadd.f32 %v148_v22, %v49_v19 }
  0xcf   :  { %v159_v27 = vmax.f32 %v149_v25, 0.0  ;;  %386 = vmatprep.subr.mxu1 %v160_v24 }
  0xd0   :  { %387 = vmatpush3.msra.mxu1 %v160_v24 }
  0xd1   :  { %388 = vmatprep.subr.mxu1 %v159_v27 }
  0xd2   :  { %389 = vmatpush3.msra.mxu1 %v159_v27 }
  0xd3   :  { %390 = vmatprep.subr.mxu1 %v158_v28 }
  0xd4   :  { %391 = vmatpush3.msra.mxu1 %v158_v28 }
  0xd5   :  { %392 = vmatprep.subr.mxu1 %v157_v29 }
  0xd6   :  { %393 = vmatpush3.msra.mxu1 %v157_v29 }
  0xd7   :  { %395 = vmatmul.mubr.msk.f32.vlgmr.msra.gmra.mxu1 %vm175_vm1, %v162_v30 }
 0x197   :  { %v396_v33 = vpop.f32.mrf.mxu1 }
 0x198   :  { %v254_v34 = vadd.f32 %v396_v33, %v173_v32 }
 0x199   :  { %v248_v36 = vpop.f32.mrf.mxu1 }
 0x19a   :  { %v258_v37 = vmax.f32 %v254_v34, 0.0  ;;  %v249_v38 = vadd.f32 %v248_v36, %v168_v35 }
 0x19c   :  { %v257_v39 = vmax.f32 %v249_v38, 0.0  ;;  %398 = vmatpush3.msra.mxu0 %v258_v37 }
 0x19d   :  { %399 = vmatprep.subr.mxu0 %v433_v31 }
 0x19e   :  { %400 = vmatpush3.msra.mxu0 %v257_v39 }
 0x19f   :  { %402 = vmatmul.mubr.msk.f32.vlgmr.msra.gmra.mxu0 %vm266_vm3, %v259_v40 }
 0x25f   :  { %v336_v42 = vpop.f32.mrf.mxu0 }
 0x260   :  { %v337_v43 = vadd.f32 %v336_v42, %v264_v41 }
 0x261   :  { %v403_v44 = vpop.f32.mrf.mxu0 }
 0x262   :  { %341 = vst.msk [vmem:[#allocation2] sm:$0x3] %vm340_vm4, %v337_v43 }
 0x263   :  { %421 = shalt.err (!%p418_p4)
}
 0x264   :  { %351 = dma.vmem_to_hbm [thread:$0]  %s349_s26, 32, %s539_s7, [#allocation3]  }
 0x265   :  { %430 = dma.done.wait [#allocation3], 32  }
 0x266   :  { %431 = vsyncadd [#allocation3], 4294967264 }
 0x267   :  { %355 = vsyncpa [#allocation3], 1 }

</bundles_post_ra>
